<compile_context>
chip_gen: v5e
topology: v5e:2x2
jax: 0.10.0
libtpu: 0.0.40
codegen_flags: <defaults>
</compile_context>

<pallas_src>
import jax
import jax.numpy as jnp
import numpy as np
from jax.experimental import pallas as pl
from jax.experimental.pallas import tpu as pltpu  # noqa: F401  (TPU backend parity)

_LANE = 128  # lane width: pad the flattened prior count to a multiple of this


def _materialize_kernel(table_ref, out_ref):
    """Single unmasked, lane-dense store of the host-baked prior table."""
    out_ref[...] = table_ref[...]


def _build_prior_table(num_cells, base_scale, aspect_ratios):
    """Host-side (numpy, trace-time) construction of the fused prior table.

    Returns:
      table:  np.float32 of shape (1, 2*P).  Lanes [0, P) hold all centers
              concatenated layer-by-layer (cell-major, ratio inner); lanes
              [P, 2*P) hold the matching widths.  P = total priors padded up
              to a multiple of 128 lanes; padding lanes are zero.
      slices: list of (offset, count) per layer into the unpadded ordering.
      P:      the padded per-row lane count.
    """
    centers, widths, slices = [], [], []
    off = 0
    for L, scale, ratios in zip(num_cells, base_scale, aspect_ratios):
        L = int(L)
        R = len(ratios)
        # Exactly mirror the PyTorch reference formulas.
        center_set = [1.0 / L * i + 0.5 / L for i in range(L)]
        width_set = [scale * r for r in ratios]
        c = np.repeat(np.asarray(center_set, dtype=np.float64), R)  # cell outer
        w = np.tile(np.asarray(width_set, dtype=np.float64), L)     # ratio inner
        centers.append(c)
        widths.append(w)
        slices.append((off, L * R))
        off += L * R

    total = off
    P = max(_LANE, ((total + _LANE - 1) // _LANE) * _LANE)
    table = np.zeros((1, 2 * P), dtype=np.float32)
    table[0, :total] = np.concatenate(centers).astype(np.float32)
    table[0, P:P + total] = np.concatenate(widths).astype(np.float32)
    return table, slices, P


def _generate_all_priors(num_cells, base_scale, aspect_ratios):
    """One gridless pallas_call that materializes the fused (1, 2*P) slab."""
    table_np, slices, P = _build_prior_table(num_cells, base_scale, aspect_ratios)
    shape = table_np.shape  # (1, 2*P)

    slab = pl.pallas_call(
        _materialize_kernel,
        out_shape=jax.ShapeDtypeStruct(shape, jnp.float32),
        # Single block == full array; lane dim is a multiple of 128, so the
        # store is unmasked and lane-dense.  No grid, no compiler_params.
        in_specs=[pl.BlockSpec(shape, lambda: (0, 0))],
        out_specs=pl.BlockSpec(shape, lambda: (0, 0)),
    )(jnp.asarray(table_np))
    return slab, slices, P


class PriorBoxPallas:
    """JAX/Pallas port of the PyTorch PriorBox module."""

    def __init__(self, config):
        self.layer_names = config["layer_names"]
        self.num_cells = config["num_cells"]
        self.base_scale = config["base_scale"]
        self.aspect_ratios = config["aspect_ratios"]
        self.priors_center = {}
        self.priors_width = {}
        self._generating_box()

    def _generating_box(self):
        slab, slices, P = _generate_all_priors(
            self.num_cells, self.base_scale, self.aspect_ratios
        )
        # One device->host pull (a couple of KiB), then slice in numpy and
        # device_put each layer once — avoids per-layer XLA slice dispatches.
        slab_host = np.asarray(jax.block_until_ready(slab))
        for layer_name, (off, n) in zip(self.layer_names, slices):
            center = jnp.asarray(slab_host[0, off:off + n].reshape(1, n))
            width = jnp.asarray(slab_host[0, P + off:P + off + n].reshape(1, n))
            self.priors_center.setdefault(layer_name, center)
            self.priors_width.setdefault(layer_name, width)

    def forward(self, output_name):
        # Matches the PyTorch module: a name -> (center, width) lookup.
        return (self.priors_center[output_name], self.priors_width[output_name])

    __call__ = forward


def _numpy_reference(layer_step, scale, ratios):
    width_set = [scale * r for r in ratios]
    center_set = [1.0 / layer_step * i + 0.5 / layer_step for i in range(layer_step)]
    width_default, center_default = [], []
    for i in range(layer_step):
        for j in range(len(ratios)):
            width_default.append(width_set[j])
            center_default.append(center_set[i])
    return (
        np.array(center_default, dtype=np.float32).reshape(1, -1),
        np.array(width_default, dtype=np.float32).reshape(1, -1),
    )


if __name__ == "__main__":
    # The module takes no tensor inputs (forward() is a name lookup); the PRNG
    # key is kept only for determinism-convention parity.
    _ = jax.random.PRNGKey(0)

    config = {
        "layer_names": ["AL1", "AL2", "AL3"],
        "num_cells": [16, 8, 4],
        "base_scale": [1.0 / 16, 1.0 / 8, 1.0 / 4],
        "aspect_ratios": [
            [0.5, 0.75, 1.0, 1.5, 2.0],
            [0.5, 0.75, 1.0, 1.5, 2.0],
            [0.5, 0.75, 1.0, 1.5, 2.0],
        ],
    }

    prior_box = PriorBoxPallas(config)

    ok = True
    for name, steps, scale, ratios in zip(
        config["layer_names"],
        config["num_cells"],
        config["base_scale"],
        config["aspect_ratios"],
    ):
        center, width = prior_box(name)
        center = jax.block_until_ready(center)
        width = jax.block_until_ready(width)

        ref_center, ref_width = _numpy_reference(steps, scale, ratios)
        assert center.shape == ref_center.shape and width.shape == ref_width.shape
        assert center.dtype == jnp.float32 and width.dtype == jnp.float32
        ok &= bool(np.allclose(np.asarray(center), ref_center, rtol=1e-6, atol=1e-6))
        ok &= bool(np.allclose(np.asarray(width), ref_width, rtol=1e-6, atol=1e-6))

    if ok:
        print("KERNEL_OK")
</pallas_src>

<mosaic_0001>
module attributes {stable_mosaic.version = 11 : i64} {
  func.func @_materialize_kernel(%arg0: memref<1x512xf32, #tpu.memory_space<vmem>>, %arg1: memref<1x512xf32, #tpu.memory_space<vmem>>) attributes {dimension_semantics = [], scalar_prefetch = 0 : i64, scratch_operands = 0 : i64, tpu.core_type = #tpu.core_type<tc>} {
    %c0 = arith.constant 0 : index
    %c0_0 = arith.constant 0 : index
    %0 = vector.load %arg0[%c0, %c0_0] : memref<1x512xf32, #tpu.memory_space<vmem>>, vector<1x512xf32>
    %c0_1 = arith.constant 0 : index
    %c0_2 = arith.constant 0 : index
    %1 = vector.load %arg1[%c0_1, %c0_2] : memref<1x512xf32, #tpu.memory_space<vmem>>, vector<1x512xf32>
    tpu.vector_store %arg1[%c0_1, %c0_2], %0 {strides = array<i32>} : memref<1x512xf32, #tpu.memory_space<vmem>>, vector<1x512xf32>,
    return
  }
}

</mosaic_0001>

<bundles_post_ra>
// kernel: tpu_custom_call.1
= control target key start
LH: loop header
LB: loop body
LE: loop exit
PB: predicated region body
PF: predicated region fallthrough
CT: control target
= control target key end

     0   :  { %6 = vsyncpa [#allocation3], 0  ;;  %s118_s0 = inlined_call_operand.hbm [shape: f32[1,512], index: 0, kind: input, shape index: {}]   ;;  %s119_s1 = inlined_call_operand.hbm [shape: f32[1,512], index: 1, kind: output, shape index: {}]  }
   0x1   :  { %7 = vsyncpa [#allocation4], 0  ;;  %s13_s8 = sshll.u32 %s118_s0, 4  ;;  %s100_s9 = smov [#allocation2]   ;;  %s14_s8 = int_to_ptr.hbm [resolvable:$true] %s13_s8 }
   0x2   :  { %s15_s10 = sshll.u32 %s100_s9, 4  ;;  %s16_s10 = int_to_ptr.vmem [resolvable:$true] %s15_s10 }
   0x3   :  { %18 = dma.hbm_to_vmem [thread:$0]  %s14_s8, 64, %s16_s10, [#allocation3]  }
   0x4   :  { %96 = dma.done.wait [#allocation3], 64  }
   0x5   :  { %97 = vsyncadd [#allocation3], 4294967232  ;;  %v24_v0 = vlaneseq  ;;  %s101_s11 = smov [#allocation5]   ;;  %s36_s15 = sshll.u32 %s119_s1, 4  ;;  %v23_v1 = vld [vmem:[#allocation2] sm:$0xf]  ;;  %s37_s15 = int_to_ptr.hbm [resolvable:$true] %s36_s15 }
   0x6   :  { %s34_s12 = sshll.u32 %s101_s11, 4  ;;  %s35_s12 = int_to_ptr.vmem [resolvable:$true] %s34_s12 }
   0x7   :  { %vm26_vm0 = vcmp.lt.s32.totalorder %v24_v0, 512 }
   0x8   :  { %28 = vst.msk [vmem:[#allocation5] sm:$0xf] %vm26_vm0, %v23_v1 }
   0x9   :  { %39 = dma.vmem_to_hbm [thread:$0]  %s35_s12, 64, %s37_s15, [#allocation4]  }
   0xa   :  { %98 = dma.done.wait [#allocation4], 64  }
   0xb   :  { %99 = vsyncadd [#allocation4], 4294967232 }
   0xc   :  { %44 = vsyncpa [#allocation3], 1 }
   0xd   :  { %45 = vsyncpa [#allocation4], 1 }

</bundles_post_ra>
